<compile_context>
chip_gen: v6e
topology: v6e:2x2x1
jax: 0.10.0
libtpu: 0.0.40
codegen_flags: <defaults>
</compile_context>

<pallas_src>
import jax
import jax.numpy as jnp
from jax.experimental import pallas as pl
from jax.experimental.pallas import tpu as pltpu


def _round_up(x: int, m: int) -> int:
    return (x + m - 1) // m * m


def _pick_tiles(r: int, t: int, itemsize: int, *, target_bytes: int, max_tr: int):
    lane = 128
    sublane = {4: 8, 2: 16, 1: 32}.get(itemsize, 8)
    r_ceil = _round_up(r, sublane)
    t_ceil = _round_up(t, lane)

    # Row cap: bound the narrow (TR,1) scratch/output VMEM cost via max_tr, and
    # keep >= 2 row tiles whenever R permits so the "parallel" row axis can
    # shard across both TensorCores on v7x.
    tr_cap = min(r_ceil, _round_up(max_tr, sublane))
    if r_ceil >= 2 * sublane:
        tr_cap = min(tr_cap, _round_up(-(-r // 2), sublane))

    # ~target_bytes of input per block: set TK from a nominal 512-row band,
    # then grow TR back into the budget (covers the small-T case).
    tr0 = min(512, tr_cap)
    tk = min(max(_round_up(target_bytes // (tr0 * itemsize), lane), lane), t_ceil)
    tr = min(max(_round_up(target_bytes // (tk * itemsize), sublane), sublane), tr_cap)
    return tr, tk, lane


def _make_stats_pool_kernel(t_true: int, tk: int):
    inv_t = 1.0 / float(t_true)
    # torch.std default is unbiased (ddof=1); T == 1 yields NaN, matching torch.
    inv_tm1 = 1.0 / float(t_true - 1) if t_true > 1 else float("nan")
    rem = t_true % tk  # valid columns in the ragged tail tile (0 => no tail)

    def kernel(x_ref, mean_ref, std_ref, sum_acc, sq_acc):
        k = pl.program_id(1)
        last = pl.num_programs(1) - 1

        @pl.when(k == 0)
        def _init():
            sum_acc[...] = jnp.zeros_like(sum_acc)
            sq_acc[...] = jnp.zeros_like(sq_acc)

        def _accumulate(xb):
            sum_acc[...] += jnp.sum(xb, axis=-1, keepdims=True)     # (TR, 1)
            sq_acc[...] += jnp.sum(xb * xb, axis=-1, keepdims=True)  # (TR, 1)

        if rem != 0:
            # Ragged tail along T: the boundary block reads unspecified memory
            # past the array. Use a select (not a multiply) so NaN/Inf garbage
            # cannot leak; mask bound is static, so only the tail block pays.
            @pl.when(k != last)
            def _acc_full():
                _accumulate(x_ref[...].astype(jnp.float32))

            @pl.when(k == last)
            def _acc_tail():
                xb = x_ref[...].astype(jnp.float32)
                col = jax.lax.broadcasted_iota(jnp.int32, xb.shape, 1)
                _accumulate(jnp.where(col < rem, xb, 0.0))
        else:
            _accumulate(x_ref[...].astype(jnp.float32))

        @pl.when(k == last)
        def _finalize():
            s = sum_acc[...]
            mean = s * inv_t
            var = jnp.maximum((sq_acc[...] - s * mean) * inv_tm1, 0.0)
            mean_ref[...] = mean.astype(mean_ref.dtype)
            std_ref[...] = jnp.sqrt(var).astype(std_ref.dtype)

    return kernel


def stats_pool(x, *, target_block_bytes: int = 8 << 20, max_tr: int = 2048):
    """x: (B, C, *spatial). Returns (B, 2*C) = concat([mean, std(ddof=1)], 1)
    over the flattened dims >= 2 (PyTorch StatsPool semantics)."""
    b, c = x.shape[0], x.shape[1]
    x_flat = x.reshape(b * c, -1)
    r, t = x_flat.shape
    itemsize = jnp.dtype(x.dtype).itemsize

    tr, tk, lane = _pick_tiles(r, t, itemsize,
                               target_bytes=target_block_bytes, max_tr=max_tr)
    grid = (pl.cdiv(r, tr), pl.cdiv(t, tk))

    # VMEM budget: double-buffered input tile + two f32 (TR,1) accumulators
    # + two (TR,1) outputs (conservatively double-buffered, 128-lane padded).
    in_block = tr * tk * itemsize
    vmem_est = (2 * in_block
                + 2 * tr * lane * 4
                + 4 * tr * lane * itemsize
                + (2 << 20))
    vmem_limit = int(min(max(vmem_est, 32 << 20), 64 << 20))

    cost = pl.CostEstimate(
        flops=3 * r * t,                     # square + two accumulate adds / elem
        transcendentals=0,
        bytes_accessed=r * t * itemsize + 2 * r * itemsize,
    )

    mean_col, std_col = pl.pallas_call(
        _make_stats_pool_kernel(t, tk),
        out_shape=(
            jax.ShapeDtypeStruct((r, 1), x.dtype),
            jax.ShapeDtypeStruct((r, 1), x.dtype),
        ),
        grid_spec=pltpu.PrefetchScalarGridSpec(
            num_scalar_prefetch=0,
            grid=grid,
            in_specs=[pl.BlockSpec((tr, tk), lambda i, k: (i, k))],
            out_specs=(
                pl.BlockSpec((tr, 1), lambda i, k: (i, 0)),
                pl.BlockSpec((tr, 1), lambda i, k: (i, 0)),
            ),
            scratch_shapes=[
                pltpu.VMEM((tr, 1), jnp.float32),
                pltpu.VMEM((tr, 1), jnp.float32),
            ],
        ),
        compiler_params=pltpu.CompilerParams(
            dimension_semantics=("parallel", "arbitrary"),
            vmem_limit_bytes=vmem_limit,
        ),
        cost_estimate=cost,
    )(x_flat)

    mean = mean_col[:, 0].reshape(b, c)
    std = std_col[:, 0].reshape(b, c)
    return jnp.concatenate([mean, std], axis=1)


if __name__ == "__main__":
    key = jax.random.PRNGKey(0)
    B, C, H, W = 2, 4, 16, 16
    x = jax.random.normal(key, (B, C, H, W), dtype=jnp.float32)

    out = stats_pool(x)
    jax.block_until_ready(out)

    # Reference (plain JAX), matching torch: mean + unbiased std over dims >= 2.
    xf = x.reshape(B, C, -1)
    mean_ref = xf.mean(axis=2)
    std_ref = jnp.std(xf, axis=2, ddof=1)
    ref = jnp.concatenate([mean_ref, std_ref], axis=1)

    assert out.shape == (B, 2 * C), out.shape
    assert out.dtype == x.dtype
    assert jnp.allclose(out, ref, atol=1e-4, rtol=1e-4), float(jnp.max(jnp.abs(out - ref)))

    print("KERNEL_OK")
</pallas_src>

<mosaic_0001>
module attributes {stable_mosaic.version = 11 : i64} {
  func.func @kernel(%arg0: i32, %arg1: i32, %arg2: memref<8x256xf32, #tpu.memory_space<vmem>>, %arg3: memref<8x1xf32, #tpu.memory_space<vmem>>, %arg4: memref<8x1xf32, #tpu.memory_space<vmem>>, %arg5: memref<8x1xf32, #tpu.memory_space<vmem>>, %arg6: memref<8x1xf32, #tpu.memory_space<vmem>>) attributes {dimension_semantics = [#tpu.dimension_semantics<parallel>, #tpu.dimension_semantics<arbitrary>], iteration_bounds = array<i64: 1, 1>, scalar_prefetch = 0 : i64, scratch_operands = 2 : i64, tpu.core_type = #tpu.core_type<tc>, window_params = [{transform_indices = @transform_0, window_bounds = array<i64: 8, 256>}, {transform_indices = @transform_1, window_bounds = array<i64: 8, 1>}, {transform_indices = @transform_2, window_bounds = array<i64: 8, 1>}]} {
    %c0_i32 = arith.constant 0 : i32
    %0 = arith.cmpi eq, %arg1, %c0_i32 : i32
    %1 = arith.extui %0 : i1 to i32
    %c0_i32_0 = arith.constant 0 : i32
    %2 = arith.cmpi ne, %1, %c0_i32_0 : i32
    scf.if %2 {
      %cst_13 = arith.constant 0.000000e+00 : f32
      %18 = vector.broadcast %cst_13 : f32 to vector<8x1xf32>
      %c0_14 = arith.constant 0 : index
      %c0_15 = arith.constant 0 : index
      %19 = vector.load %arg5[%c0_14, %c0_15] : memref<8x1xf32, #tpu.memory_space<vmem>>, vector<8x1xf32>
      tpu.vector_store %arg5[%c0_14, %c0_15], %18 {strides = array<i32>} : memref<8x1xf32, #tpu.memory_space<vmem>>, vector<8x1xf32>,
      %cst_16 = arith.constant 0.000000e+00 : f32
      %20 = vector.broadcast %cst_16 : f32 to vector<8x1xf32>
      %c0_17 = arith.constant 0 : index
      %c0_18 = arith.constant 0 : index
      %21 = vector.load %arg6[%c0_17, %c0_18] : memref<8x1xf32, #tpu.memory_space<vmem>>, vector<8x1xf32>
      tpu.vector_store %arg6[%c0_17, %c0_18], %20 {strides = array<i32>} : memref<8x1xf32, #tpu.memory_space<vmem>>, vector<8x1xf32>,
    } else {
    }
    %c0 = arith.constant 0 : index
    %c0_1 = arith.constant 0 : index
    %3 = vector.load %arg2[%c0, %c0_1] : memref<8x256xf32, #tpu.memory_space<vmem>>, vector<8x256xf32>
    %c0_2 = arith.constant 0 : index
    %c0_3 = arith.constant 0 : index
    %4 = vector.load %arg5[%c0_2, %c0_3] : memref<8x1xf32, #tpu.memory_space<vmem>>, vector<8x1xf32>
    %cst = arith.constant dense<0.000000e+00> : vector<8xf32>
    %5 = vector.multi_reduction <add>, %3, %cst [1] : vector<8x256xf32> to vector<8xf32>
    %6 = vector.shape_cast %5 : vector<8xf32> to vector<8x1xf32>
    %7 = arith.addf %4, %6 : vector<8x1xf32>
    %c0_4 = arith.constant 0 : index
    %c0_5 = arith.constant 0 : index
    %8 = vector.load %arg5[%c0_4, %c0_5] : memref<8x1xf32, #tpu.memory_space<vmem>>, vector<8x1xf32>
    tpu.vector_store %arg5[%c0_4, %c0_5], %7 {strides = array<i32>} : memref<8x1xf32, #tpu.memory_space<vmem>>, vector<8x1xf32>,
    %c0_6 = arith.constant 0 : index
    %c0_7 = arith.constant 0 : index
    %9 = vector.load %arg6[%c0_6, %c0_7] : memref<8x1xf32, #tpu.memory_space<vmem>>, vector<8x1xf32>
    %10 = arith.mulf %3, %3 : vector<8x256xf32>
    %cst_8 = arith.constant dense<0.000000e+00> : vector<8xf32>
    %11 = vector.multi_reduction <add>, %10, %cst_8 [1] : vector<8x256xf32> to vector<8xf32>
    %12 = vector.shape_cast %11 : vector<8xf32> to vector<8x1xf32>
    %13 = arith.addf %9, %12 : vector<8x1xf32>
    %c0_9 = arith.constant 0 : index
    %c0_10 = arith.constant 0 : index
    %14 = vector.load %arg6[%c0_9, %c0_10] : memref<8x1xf32, #tpu.memory_space<vmem>>, vector<8x1xf32>
    tpu.vector_store %arg6[%c0_9, %c0_10], %13 {strides = array<i32>} : memref<8x1xf32, #tpu.memory_space<vmem>>, vector<8x1xf32>,
    %c0_i32_11 = arith.constant 0 : i32
    %15 = arith.cmpi eq, %arg1, %c0_i32_11 : i32
    %16 = arith.extui %15 : i1 to i32
    %c0_i32_12 = arith.constant 0 : i32
    %17 = arith.cmpi ne, %16, %c0_i32_12 : i32
    scf.if %17 {
      %c0_13 = arith.constant 0 : index
      %c0_14 = arith.constant 0 : index
      %18 = vector.load %arg5[%c0_13, %c0_14] : memref<8x1xf32, #tpu.memory_space<vmem>>, vector<8x1xf32>
      %cst_15 = arith.constant 3.906250e-03 : f32
      %19 = vector.broadcast %cst_15 : f32 to vector<8x1xf32>
      %20 = arith.mulf %18, %19 : vector<8x1xf32>
      %c0_16 = arith.constant 0 : index
      %c0_17 = arith.constant 0 : index
      %21 = vector.load %arg6[%c0_16, %c0_17] : memref<8x1xf32, #tpu.memory_space<vmem>>, vector<8x1xf32>
      %22 = arith.mulf %18, %20 : vector<8x1xf32>
      %23 = arith.subf %21, %22 : vector<8x1xf32>
      %cst_18 = arith.constant 0.00392156886 : f32
      %24 = vector.broadcast %cst_18 : f32 to vector<8x1xf32>
      %25 = arith.mulf %23, %24 : vector<8x1xf32>
      %cst_19 = arith.constant 0.000000e+00 : f32
      %26 = vector.broadcast %cst_19 : f32 to vector<8x1xf32>
      %27 = arith.maximumf %25, %26 : vector<8x1xf32>
      %c0_20 = arith.constant 0 : index
      %c0_21 = arith.constant 0 : index
      %28 = vector.load %arg3[%c0_20, %c0_21] : memref<8x1xf32, #tpu.memory_space<vmem>>, vector<8x1xf32>
      tpu.vector_store %arg3[%c0_20, %c0_21], %20 {strides = array<i32>} : memref<8x1xf32, #tpu.memory_space<vmem>>, vector<8x1xf32>,
      %29 = math.sqrt %27 : vector<8x1xf32>
      %c0_22 = arith.constant 0 : index
      %c0_23 = arith.constant 0 : index
      %30 = vector.load %arg4[%c0_22, %c0_23] : memref<8x1xf32, #tpu.memory_space<vmem>>, vector<8x1xf32>
      tpu.vector_store %arg4[%c0_22, %c0_23], %29 {strides = array<i32>} : memref<8x1xf32, #tpu.memory_space<vmem>>, vector<8x1xf32>,
    } else {
    }
    return
  }
  func.func @transform_0(%arg0: i32, %arg1: i32) -> (i32, i32) {
    %c0_i32 = arith.constant 0 : i32
    return %arg0, %arg1 : i32, i32
  }
  func.func @transform_1(%arg0: i32, %arg1: i32) -> (i32, i32) {
    %c0_i32 = arith.constant 0 : i32
    %c0_i32_0 = arith.constant 0 : i32
    return %arg0, %c0_i32 : i32, i32
  }
  func.func @transform_2(%arg0: i32, %arg1: i32) -> (i32, i32) {
    %c0_i32 = arith.constant 0 : i32
    %c0_i32_0 = arith.constant 0 : i32
    return %arg0, %c0_i32 : i32, i32
  }
}

</mosaic_0001>

<bundles_post_ra>
// kernel: tpu_custom_call.1
= control target key start
LH: loop header
LB: loop body
LE: loop exit
PB: predicated region body
PF: predicated region fallthrough
CT: control target
= control target key end

     0   :  { %8 = vsyncpa [#allocation5], 0  ;;  %s100_s9 = smov [#allocation4]   ;;  %s132_s0 = inlined_call_operand.hbm [shape: f32[8,256], index: 0, kind: input, shape index: {}]   ;;  %s133_s1 = inlined_call_operand.vmem [shape: f32[8,1], index: 1, kind: output, shape index: {0}]   ;;  %s134_s2 = inlined_call_operand.vmem [shape: f32[8,1], index: 2, kind: output, shape index: {1}]  }
   0x1   :  { %s15_s10 = sshll.u32 %s100_s9, 4  ;;  %s16_s10 = int_to_ptr.vmem [resolvable:$true] %s15_s10 }
   0x2   :  { %s86_s11 = scalar_lea.vmem %s16_s10, 256  ;;  %p91_p1 = scmp.lt.s32.totalorder %s16_s10, %s16_s10 }
   0x3   :  { %p87_p0 = scmp.ne.s32.totalorder %s16_s10, %s86_s11  ;;  %p92_p2 = scmp.lt.s32.totalorder %s86_s11, %s86_s11 }
   0x5   :  { %p93_p3 = por %p92_p2, %p91_p1 }
   0x7   :  { %p94_p4 = pnand %p93_p3, %p87_p0 }
   0x9   :  { %97 = shalt.err (!%p94_p4)
}
   0xa   :  { %18 = dma.hbm_to_vmem [thread:$0]  %s132_s0, 256, %s16_s10, [#allocation5]  }
   0xb   :  { %98 = dma.done.wait [#allocation5], 256  }
   0xc   :  { %99 = vsyncadd [#allocation5], 4294967040  ;;  %vm26_vm0 = vcmask 7168   ;;  %v101_v0 = vmov 0.0   ;;  %v29_v1 = vld [vmem:[#allocation4] sm:$0xff]  ;;  %v30_v2 = vld [vmem:[#allocation4 + $0x8] sm:$0xff] }
   0xd   :  { %27 = vst.msk [vmem:[#allocation2] sm:$0xff] %vm26_vm0, %v101_v0  ;;  %28 = vst.msk [vmem:[#allocation3] sm:$0xff] %vm26_vm0, %v101_v0  ;;  %v32_v3 = vadd.f32 %v30_v2, %v29_v1  ;;  %v39_v4 = vmul.f32 %v29_v1, %v29_v1  ;;  %v40_v5 = vmul.f32 %v30_v2, %v30_v2 }
   0xf   :  { %33 = vadd.xlane.f32.xlu0 %v32_v3  ;;  %v41_v6 = vadd.f32 %v40_v5, %v39_v4 }
  0x13   :  { %42 = vadd.xlane.f32.xlu0 %v41_v6 }
  0x14   :  { %v31_v7 = vld [vmem:[#allocation2] sm:$0xff]  ;;  %v38_v10 = vld [vmem:[#allocation3] sm:$0xff] }
  0x98   :  { %v34_v8 = vpop.xlane.xlu0 %33 }
  0x99   :  { %v35_v9 = vadd.f32 %v34_v8, %v31_v7 }
  0x9b   :  { %37 = vst.msk [vmem:[#allocation2] sm:$0xff] %vm26_vm0, %v35_v9 }
  0x9c   :  { %v43_v11 = vpop.xlane.xlu0 %42 }
  0x9d   :  { %v44_v12 = vadd.f32 %v43_v11, %v38_v10 }
  0x9f   :  { %45 = vst.msk [vmem:[#allocation3] sm:$0xff] %vm26_vm0, %v44_v12 }
  0xa2   :  { %v49_v13 = vld [vmem:[#allocation2] sm:$0xff] }
  0xa3   :  { %v50_v14 = vmul.f32 0.00390625, %v49_v13 }
  0xa5   :  { %v52_v15 = vmul.f32 %v50_v14, %v49_v13  ;;  %56 = vst.msk [vmem:[%s133_s1] sm:$0xff] %vm26_vm0, %v50_v14 }
  0xa6   :  { %v51_v16 = vld [vmem:[#allocation3] sm:$0xff] }
  0xa7   :  { %v53_v17 = vsub.f32 %v51_v16, %v52_v15 }
  0xa9   :  { %v54_v18 = vmul.f32 0.003921569, %v53_v17 }
  0xab   :  { %v55_v19 = vmax.f32 %v54_v18, 0.0 }
  0xad   :  { %76 = vrsqrt.f32 %v55_v19  ;;  %vm59_vm1 = vcmp.eq.f32.partialorder %v55_v19, inf  ;;  %v62_v22 = vand.u32 2147483648, %v55_v19  ;;  %vm61_vm2 = vcmp.eq.f32.partialorder %v55_v19, 0.0 }
  0xba   :  { %v77_v20 = vpop.eup %76 }
  0xbb   :  { %v58_v21 = vmul.f32 %v77_v20, %v55_v19 }
  0xbd   :  { %v60_v23 = vsel %vm59_vm1, %v55_v19, %v58_v21 }
  0xbe   :  { %v63_v24 = vsel %vm61_vm2, %v62_v22, %v60_v23 }
  0xbf   :  { %64 = vst.msk [vmem:[%s134_s2] sm:$0xff] %vm26_vm0, %v63_v24 }
  0xc0   :  { %73 = vsyncpa [#allocation5], 1 }

</bundles_post_ra>
